<compile_context>
chip_gen: v5e
topology: v5e:2x2
jax: 0.10.0
libtpu: 0.0.40
codegen_flags: <defaults>
</compile_context>

<pallas_src>
import functools

import jax
import jax.numpy as jnp
from jax.experimental import pallas as pl
from jax.experimental.pallas import tpu as pltpu


def _residual_kernel(x_ref, w1_ref, b1_ref, w2_ref, b2_ref,
                     o_ref, xs_ref, hs_ref, *, H, W):
    """Fused Residual forward for one batch element.

    Layout: channels on sublanes, flattened spatial H*W on lanes.

      x_ref  : (Cin,  H*W)            concatenated (dyn, cont) activations
      w1_ref : (Cout, 9*Cin)          conv1 weights, tap-stacked along K
      b1_ref : (Cout, 1)
      w2_ref : (Cout, 9*Cout)         conv2 weights, tap-stacked along K
      b2_ref : (Cout, 1)
      o_ref  : (Cout, H*W)
      xs_ref : (9*Cin,  H*W) f32 VMEM scratch — im2col block for conv1
      hs_ref : (9*Cout, H*W) f32 VMEM scratch — im2col block for conv2
    """
    HW = H * W
    Cin = x_ref.shape[0]
    Cout = o_ref.shape[0]

    # ---- border masks for the 8 off-center taps (lane iota + VPU compares) ----
    lane = jax.lax.broadcasted_iota(jnp.int32, (1, HW), 1)
    if (W & (W - 1)) == 0:                       # power-of-two fast path
        row = lane >> (W.bit_length() - 1)
        col = lane & (W - 1)
    else:
        row = lane // W
        col = lane % W
    masks = {}
    for dh in (-1, 0, 1):
        for dw in (-1, 0, 1):
            if dh == 0 and dw == 0:
                continue
            ok = ((row + dh >= 0) & (row + dh < H) &
                  (col + dw >= 0) & (col + dw < W))
            masks[(dh, dw)] = ok.astype(jnp.float32)

    def im2col(x, dst_ref, c):
        # dst[t*c + ci, f] = x[ci, f + dh*W + dw], zeroed where the source pixel
        # lies outside the image (== the conv's zero padding).  Per tap: one XLU
        # lane rotation + one VPU mask multiply + one aligned sublane store.
        for kh in range(3):
            for kw in range(3):
                t = kh * 3 + kw
                dh, dw = kh - 1, kw - 1
                if dh == 0 and dw == 0:
                    xt = x
                else:
                    s = (-(dh * W + dw)) % HW    # static, non-negative lane shift
                    xt = pltpu.roll(x, shift=s, axis=1) * masks[(dh, dw)]
                dst_ref[pl.ds(t * c, c), :] = xt

    # ---- conv1 + bias + ReLU  (single MXU matmul, K = 9*Cin) -------------------
    x = x_ref[...].astype(jnp.float32)
    im2col(x, xs_ref, Cin)
    h = jnp.dot(w1_ref[...], xs_ref[...], preferred_element_type=jnp.float32)
    h = jnp.maximum(h + b1_ref[...], 0.0)

    # ---- conv2 + bias  (single MXU matmul, K = 9*Cout) -------------------------
    im2col(h, hs_ref, Cout)
    y = jnp.dot(w2_ref[...], hs_ref[...], preferred_element_type=jnp.float32)
    o_ref[...] = (y + b2_ref[...]).astype(o_ref.dtype)


def _residual_pallas(x, w1s, b1, w2s, b2, *, H, W):
    B, Cin, HW = x.shape
    Cout = w2s.shape[0]
    kernel = functools.partial(_residual_kernel, H=H, W=W)
    return pl.pallas_call(
        kernel,
        out_shape=jax.ShapeDtypeStruct((B, Cout, HW), x.dtype),
        grid_spec=pltpu.PrefetchScalarGridSpec(
            num_scalar_prefetch=0,
            grid=(B,),
            in_specs=[
                pl.BlockSpec((None, Cin, HW), lambda i: (i, 0, 0)),
                pl.BlockSpec((Cout, 9 * Cin), lambda i: (0, 0)),
                pl.BlockSpec((Cout, 1), lambda i: (0, 0)),
                pl.BlockSpec((Cout, 9 * Cout), lambda i: (0, 0)),
                pl.BlockSpec((Cout, 1), lambda i: (0, 0)),
            ],
            out_specs=pl.BlockSpec((None, Cout, HW), lambda i: (i, 0, 0)),
            scratch_shapes=[
                pltpu.VMEM((9 * Cin, HW), jnp.float32),
                pltpu.VMEM((9 * Cout, HW), jnp.float32),
            ],
        ),
        compiler_params=pltpu.CompilerParams(
            dimension_semantics=("parallel",),
        ),
    )(x, w1s, b1, w2s, b2)


def init_residual_params(key, in_dim, out_dim, dtype=jnp.float32):
    """Deterministic synthetic parameters (PyTorch Conv2d weight layout OIHW)."""
    k1, k2, k3, k4 = jax.random.split(key, 4)
    scale1 = 1.0 / jnp.sqrt(in_dim * 9.0)
    scale2 = 1.0 / jnp.sqrt(out_dim * 9.0)
    return {
        "w1": jax.random.normal(k1, (out_dim, in_dim, 3, 3), dtype) * scale1,
        "b1": jax.random.normal(k2, (out_dim,), dtype) * scale1,
        "w2": jax.random.normal(k3, (out_dim, out_dim, 3, 3), dtype) * scale2,
        "b2": jax.random.normal(k4, (out_dim,), dtype) * scale2,
    }


@jax.jit
def residual_forward(input_dyn, input_cont, params):
    """Matches Residual.forward: inputs/outputs are NCHW like PyTorch."""
    B, C_dyn, H, W = input_dyn.shape
    C_cont = input_cont.shape[1]
    Cin = C_dyn + C_cont
    Cout = params["w1"].shape[0]

    # torch.cat((dyn, cont), dim=1); then a free metadata reshape NCHW -> (B,C,H*W).
    # Channels land on sublanes, the flattened spatial axis (lane multiple) on lanes.
    x = jnp.concatenate([input_dyn, input_cont], axis=1).reshape(B, Cin, H * W)

    # Tiny one-off weight re-layout: tap-stacked (Cout, 9*Cin) matrices so each conv
    # is a single MXU matmul against the im2col block built in-kernel.
    # Column index t*Cin + ci  <->  w[co, ci, kh, kw] with t = kh*3 + kw.
    w1s = jnp.transpose(params["w1"], (0, 2, 3, 1)).reshape(Cout, 9 * Cin)
    w2s = jnp.transpose(params["w2"], (0, 2, 3, 1)).reshape(Cout, 9 * Cout)
    b1 = params["b1"].reshape(Cout, 1)
    b2 = params["b2"].reshape(Cout, 1)

    y = _residual_pallas(x, w1s, b1, w2s, b2, H=H, W=W)
    return y.reshape(B, Cout, H, W)                # already NCHW — no transpose


def _reference_forward(input_dyn, input_cont, params):
    """Pure-JAX reference (lax conv) for validation."""
    x = jnp.concatenate([input_dyn, input_cont], axis=1)
    dn = ("NCHW", "OIHW", "NCHW")
    h = jax.lax.conv_general_dilated(
        x, params["w1"], (1, 1), ((1, 1), (1, 1)), dimension_numbers=dn
    ) + params["b1"][None, :, None, None]
    h = jnp.maximum(h, 0.0)
    y = jax.lax.conv_general_dilated(
        h, params["w2"], (1, 1), ((1, 1), (1, 1)), dimension_numbers=dn
    ) + params["b2"][None, :, None, None]
    return y


if __name__ == "__main__":
    key = jax.random.PRNGKey(0)
    k_dyn, k_cont, k_params = jax.random.split(key, 3)

    B, C_each, H, W = 2, 4, 16, 16            # each encoder branch has 4 channels
    in_dim = 2 * C_each                        # concatenated channels = 8
    out_dim = 8

    input_dyn = jax.random.normal(k_dyn, (B, C_each, H, W), jnp.float32)
    input_cont = jax.random.normal(k_cont, (B, C_each, H, W), jnp.float32)
    params = init_residual_params(k_params, in_dim, out_dim)

    out = residual_forward(input_dyn, input_cont, params)
    out = jax.block_until_ready(out)

    ref = _reference_forward(input_dyn, input_cont, params)
    assert out.shape == (B, out_dim, H, W)
    assert jnp.allclose(out, ref, atol=1e-3, rtol=1e-3), "mismatch vs reference"

    print("KERNEL_OK")
</pallas_src>

<mosaic_0001>
module attributes {stable_mosaic.version = 11 : i64} {
  func.func @_residual_kernel(%arg0: i32, %arg1: memref<1x8x256xf32, #tpu.memory_space<vmem>>, %arg2: memref<8x72xf32, #tpu.memory_space<vmem>>, %arg3: memref<8x1xf32, #tpu.memory_space<vmem>>, %arg4: memref<8x72xf32, #tpu.memory_space<vmem>>, %arg5: memref<8x1xf32, #tpu.memory_space<vmem>>, %arg6: memref<1x8x256xf32, #tpu.memory_space<vmem>>, %arg7: memref<72x256xf32, #tpu.memory_space<vmem>>, %arg8: memref<72x256xf32, #tpu.memory_space<vmem>>) attributes {dimension_semantics = [#tpu.dimension_semantics<parallel>], iteration_bounds = array<i64: 2>, scalar_prefetch = 0 : i64, scratch_operands = 2 : i64, tpu.core_type = #tpu.core_type<tc>, window_params = [{transform_indices = @transform_0, window_bounds = array<i64: 1, 8, 256>}, {pipeline_mode = #tpu.pipeline_mode<synchronous>, transform_indices = @transform_1, window_bounds = array<i64: 8, 72>}, {pipeline_mode = #tpu.pipeline_mode<synchronous>, transform_indices = @transform_2, window_bounds = array<i64: 8, 1>}, {pipeline_mode = #tpu.pipeline_mode<synchronous>, transform_indices = @transform_3, window_bounds = array<i64: 8, 72>}, {pipeline_mode = #tpu.pipeline_mode<synchronous>, transform_indices = @transform_4, window_bounds = array<i64: 8, 1>}, {transform_indices = @transform_5, window_bounds = array<i64: 1, 8, 256>}]} {
    %0 = tpu.iota {dimensions = array<i32: 1>} : vector<1x256xi32>
    %c4_i32 = arith.constant 4 : i32
    %1 = vector.broadcast %c4_i32 : i32 to vector<1x256xi32>
    %2 = arith.shrsi %0, %1 : vector<1x256xi32>
    %c15_i32 = arith.constant 15 : i32
    %3 = vector.broadcast %c15_i32 : i32 to vector<1x256xi32>
    %4 = arith.andi %0, %3 : vector<1x256xi32>
    %c-1_i32 = arith.constant -1 : i32
    %5 = vector.broadcast %c-1_i32 : i32 to vector<1x256xi32>
    %6 = arith.addi %2, %5 : vector<1x256xi32>
    %c0_i32 = arith.constant 0 : i32
    %7 = vector.broadcast %c0_i32 : i32 to vector<1x256xi32>
    %8 = arith.cmpi sge, %6, %7 : vector<1x256xi32>
    %c-1_i32_0 = arith.constant -1 : i32
    %9 = vector.broadcast %c-1_i32_0 : i32 to vector<1x256xi32>
    %10 = arith.addi %2, %9 : vector<1x256xi32>
    %c16_i32 = arith.constant 16 : i32
    %11 = vector.broadcast %c16_i32 : i32 to vector<1x256xi32>
    %12 = arith.cmpi slt, %10, %11 : vector<1x256xi32>
    %13 = arith.andi %8, %12 : vector<1x256xi1>
    %c-1_i32_1 = arith.constant -1 : i32
    %14 = vector.broadcast %c-1_i32_1 : i32 to vector<1x256xi32>
    %15 = arith.addi %4, %14 : vector<1x256xi32>
    %c0_i32_2 = arith.constant 0 : i32
    %16 = vector.broadcast %c0_i32_2 : i32 to vector<1x256xi32>
    %17 = arith.cmpi sge, %15, %16 : vector<1x256xi32>
    %18 = arith.andi %13, %17 : vector<1x256xi1>
    %c-1_i32_3 = arith.constant -1 : i32
    %19 = vector.broadcast %c-1_i32_3 : i32 to vector<1x256xi32>
    %20 = arith.addi %4, %19 : vector<1x256xi32>
    %c16_i32_4 = arith.constant 16 : i32
    %21 = vector.broadcast %c16_i32_4 : i32 to vector<1x256xi32>
    %22 = arith.cmpi slt, %20, %21 : vector<1x256xi32>
    %23 = arith.andi %18, %22 : vector<1x256xi1>
    %24 = arith.extui %23 : vector<1x256xi1> to vector<1x256xi32>
    %25 = arith.sitofp %24 : vector<1x256xi32> to vector<1x256xf32>
    %c-1_i32_5 = arith.constant -1 : i32
    %26 = vector.broadcast %c-1_i32_5 : i32 to vector<1x256xi32>
    %27 = arith.addi %2, %26 : vector<1x256xi32>
    %c0_i32_6 = arith.constant 0 : i32
    %28 = vector.broadcast %c0_i32_6 : i32 to vector<1x256xi32>
    %29 = arith.cmpi sge, %27, %28 : vector<1x256xi32>
    %c-1_i32_7 = arith.constant -1 : i32
    %30 = vector.broadcast %c-1_i32_7 : i32 to vector<1x256xi32>
    %31 = arith.addi %2, %30 : vector<1x256xi32>
    %c16_i32_8 = arith.constant 16 : i32
    %32 = vector.broadcast %c16_i32_8 : i32 to vector<1x256xi32>
    %33 = arith.cmpi slt, %31, %32 : vector<1x256xi32>
    %34 = arith.andi %29, %33 : vector<1x256xi1>
    %c0_i32_9 = arith.constant 0 : i32
    %35 = vector.broadcast %c0_i32_9 : i32 to vector<1x256xi32>
    %36 = arith.addi %4, %35 : vector<1x256xi32>
    %c0_i32_10 = arith.constant 0 : i32
    %37 = vector.broadcast %c0_i32_10 : i32 to vector<1x256xi32>
    %38 = arith.cmpi sge, %36, %37 : vector<1x256xi32>
    %39 = arith.andi %34, %38 : vector<1x256xi1>
    %c0_i32_11 = arith.constant 0 : i32
    %40 = vector.broadcast %c0_i32_11 : i32 to vector<1x256xi32>
    %41 = arith.addi %4, %40 : vector<1x256xi32>
    %c16_i32_12 = arith.constant 16 : i32
    %42 = vector.broadcast %c16_i32_12 : i32 to vector<1x256xi32>
    %43 = arith.cmpi slt, %41, %42 : vector<1x256xi32>
    %44 = arith.andi %39, %43 : vector<1x256xi1>
    %45 = arith.extui %44 : vector<1x256xi1> to vector<1x256xi32>
    %46 = arith.sitofp %45 : vector<1x256xi32> to vector<1x256xf32>
    %c-1_i32_13 = arith.constant -1 : i32
    %47 = vector.broadcast %c-1_i32_13 : i32 to vector<1x256xi32>
    %48 = arith.addi %2, %47 : vector<1x256xi32>
    %c0_i32_14 = arith.constant 0 : i32
    %49 = vector.broadcast %c0_i32_14 : i32 to vector<1x256xi32>
    %50 = arith.cmpi sge, %48, %49 : vector<1x256xi32>
    %c-1_i32_15 = arith.constant -1 : i32
    %51 = vector.broadcast %c-1_i32_15 : i32 to vector<1x256xi32>
    %52 = arith.addi %2, %51 : vector<1x256xi32>
    %c16_i32_16 = arith.constant 16 : i32
    %53 = vector.broadcast %c16_i32_16 : i32 to vector<1x256xi32>
    %54 = arith.cmpi slt, %52, %53 : vector<1x256xi32>
    %55 = arith.andi %50, %54 : vector<1x256xi1>
    %c1_i32 = arith.constant 1 : i32
    %56 = vector.broadcast %c1_i32 : i32 to vector<1x256xi32>
    %57 = arith.addi %4, %56 : vector<1x256xi32>
    %c0_i32_17 = arith.constant 0 : i32
    %58 = vector.broadcast %c0_i32_17 : i32 to vector<1x256xi32>
    %59 = arith.cmpi sge, %57, %58 : vector<1x256xi32>
    %60 = arith.andi %55, %59 : vector<1x256xi1>
    %c1_i32_18 = arith.constant 1 : i32
    %61 = vector.broadcast %c1_i32_18 : i32 to vector<1x256xi32>
    %62 = arith.addi %4, %61 : vector<1x256xi32>
    %c16_i32_19 = arith.constant 16 : i32
    %63 = vector.broadcast %c16_i32_19 : i32 to vector<1x256xi32>
    %64 = arith.cmpi slt, %62, %63 : vector<1x256xi32>
    %65 = arith.andi %60, %64 : vector<1x256xi1>
    %66 = arith.extui %65 : vector<1x256xi1> to vector<1x256xi32>
    %67 = arith.sitofp %66 : vector<1x256xi32> to vector<1x256xf32>
    %c0_i32_20 = arith.constant 0 : i32
    %68 = vector.broadcast %c0_i32_20 : i32 to vector<1x256xi32>
    %69 = arith.addi %2, %68 : vector<1x256xi32>
    %c0_i32_21 = arith.constant 0 : i32
    %70 = vector.broadcast %c0_i32_21 : i32 to vector<1x256xi32>
    %71 = arith.cmpi sge, %69, %70 : vector<1x256xi32>
    %c0_i32_22 = arith.constant 0 : i32
    %72 = vector.broadcast %c0_i32_22 : i32 to vector<1x256xi32>
    %73 = arith.addi %2, %72 : vector<1x256xi32>
    %c16_i32_23 = arith.constant 16 : i32
    %74 = vector.broadcast %c16_i32_23 : i32 to vector<1x256xi32>
    %75 = arith.cmpi slt, %73, %74 : vector<1x256xi32>
    %76 = arith.andi %71, %75 : vector<1x256xi1>
    %c-1_i32_24 = arith.constant -1 : i32
    %77 = vector.broadcast %c-1_i32_24 : i32 to vector<1x256xi32>
    %78 = arith.addi %4, %77 : vector<1x256xi32>
    %c0_i32_25 = arith.constant 0 : i32
    %79 = vector.broadcast %c0_i32_25 : i32 to vector<1x256xi32>
    %80 = arith.cmpi sge, %78, %79 : vector<1x256xi32>
    %81 = arith.andi %76, %80 : vector<1x256xi1>
    %c-1_i32_26 = arith.constant -1 : i32
    %82 = vector.broadcast %c-1_i32_26 : i32 to vector<1x256xi32>
    %83 = arith.addi %4, %82 : vector<1x256xi32>
    %c16_i32_27 = arith.constant 16 : i32
    %84 = vector.broadcast %c16_i32_27 : i32 to vector<1x256xi32>
    %85 = arith.cmpi slt, %83, %84 : vector<1x256xi32>
    %86 = arith.andi %81, %85 : vector<1x256xi1>
    %87 = arith.extui %86 : vector<1x256xi1> to vector<1x256xi32>
    %88 = arith.sitofp %87 : vector<1x256xi32> to vector<1x256xf32>
    %c0_i32_28 = arith.constant 0 : i32
    %89 = vector.broadcast %c0_i32_28 : i32 to vector<1x256xi32>
    %90 = arith.addi %2, %89 : vector<1x256xi32>
    %c0_i32_29 = arith.constant 0 : i32
    %91 = vector.broadcast %c0_i32_29 : i32 to vector<1x256xi32>
    %92 = arith.cmpi sge, %90, %91 : vector<1x256xi32>
    %c0_i32_30 = arith.constant 0 : i32
    %93 = vector.broadcast %c0_i32_30 : i32 to vector<1x256xi32>
    %94 = arith.addi %2, %93 : vector<1x256xi32>
    %c16_i32_31 = arith.constant 16 : i32
    %95 = vector.broadcast %c16_i32_31 : i32 to vector<1x256xi32>
    %96 = arith.cmpi slt, %94, %95 : vector<1x256xi32>
    %97 = arith.andi %92, %96 : vector<1x256xi1>
    %c1_i32_32 = arith.constant 1 : i32
    %98 = vector.broadcast %c1_i32_32 : i32 to vector<1x256xi32>
    %99 = arith.addi %4, %98 : vector<1x256xi32>
    %c0_i32_33 = arith.constant 0 : i32
    %100 = vector.broadcast %c0_i32_33 : i32 to vector<1x256xi32>
    %101 = arith.cmpi sge, %99, %100 : vector<1x256xi32>
    %102 = arith.andi %97, %101 : vector<1x256xi1>
    %c1_i32_34 = arith.constant 1 : i32
    %103 = vector.broadcast %c1_i32_34 : i32 to vector<1x256xi32>
    %104 = arith.addi %4, %103 : vector<1x256xi32>
    %c16_i32_35 = arith.constant 16 : i32
    %105 = vector.broadcast %c16_i32_35 : i32 to vector<1x256xi32>
    %106 = arith.cmpi slt, %104, %105 : vector<1x256xi32>
    %107 = arith.andi %102, %106 : vector<1x256xi1>
    %108 = arith.extui %107 : vector<1x256xi1> to vector<1x256xi32>
    %109 = arith.sitofp %108 : vector<1x256xi32> to vector<1x256xf32>
    %c1_i32_36 = arith.constant 1 : i32
    %110 = vector.broadcast %c1_i32_36 : i32 to vector<1x256xi32>
    %111 = arith.addi %2, %110 : vector<1x256xi32>
    %c0_i32_37 = arith.constant 0 : i32
    %112 = vector.broadcast %c0_i32_37 : i32 to vector<1x256xi32>
    %113 = arith.cmpi sge, %111, %112 : vector<1x256xi32>
    %c1_i32_38 = arith.constant 1 : i32
    %114 = vector.broadcast %c1_i32_38 : i32 to vector<1x256xi32>
    %115 = arith.addi %2, %114 : vector<1x256xi32>
    %c16_i32_39 = arith.constant 16 : i32
    %116 = vector.broadcast %c16_i32_39 : i32 to vector<1x256xi32>
    %117 = arith.cmpi slt, %115, %116 : vector<1x256xi32>
    %118 = arith.andi %113, %117 : vector<1x256xi1>
    %c-1_i32_40 = arith.constant -1 : i32
    %119 = vector.broadcast %c-1_i32_40 : i32 to vector<1x256xi32>
    %120 = arith.addi %4, %119 : vector<1x256xi32>
    %c0_i32_41 = arith.constant 0 : i32
    %121 = vector.broadcast %c0_i32_41 : i32 to vector<1x256xi32>
    %122 = arith.cmpi sge, %120, %121 : vector<1x256xi32>
    %123 = arith.andi %118, %122 : vector<1x256xi1>
    %c-1_i32_42 = arith.constant -1 : i32
    %124 = vector.broadcast %c-1_i32_42 : i32 to vector<1x256xi32>
    %125 = arith.addi %4, %124 : vector<1x256xi32>
    %c16_i32_43 = arith.constant 16 : i32
    %126 = vector.broadcast %c16_i32_43 : i32 to vector<1x256xi32>
    %127 = arith.cmpi slt, %125, %126 : vector<1x256xi32>
    %128 = arith.andi %123, %127 : vector<1x256xi1>
    %129 = arith.extui %128 : vector<1x256xi1> to vector<1x256xi32>
    %130 = arith.sitofp %129 : vector<1x256xi32> to vector<1x256xf32>
    %c1_i32_44 = arith.constant 1 : i32
    %131 = vector.broadcast %c1_i32_44 : i32 to vector<1x256xi32>
    %132 = arith.addi %2, %131 : vector<1x256xi32>
    %c0_i32_45 = arith.constant 0 : i32
    %133 = vector.broadcast %c0_i32_45 : i32 to vector<1x256xi32>
    %134 = arith.cmpi sge, %132, %133 : vector<1x256xi32>
    %c1_i32_46 = arith.constant 1 : i32
    %135 = vector.broadcast %c1_i32_46 : i32 to vector<1x256xi32>
    %136 = arith.addi %2, %135 : vector<1x256xi32>
    %c16_i32_47 = arith.constant 16 : i32
    %137 = vector.broadcast %c16_i32_47 : i32 to vector<1x256xi32>
    %138 = arith.cmpi slt, %136, %137 : vector<1x256xi32>
    %139 = arith.andi %134, %138 : vector<1x256xi1>
    %c0_i32_48 = arith.constant 0 : i32
    %140 = vector.broadcast %c0_i32_48 : i32 to vector<1x256xi32>
    %141 = arith.addi %4, %140 : vector<1x256xi32>
    %c0_i32_49 = arith.constant 0 : i32
    %142 = vector.broadcast %c0_i32_49 : i32 to vector<1x256xi32>
    %143 = arith.cmpi sge, %141, %142 : vector<1x256xi32>
    %144 = arith.andi %139, %143 : vector<1x256xi1>
    %c0_i32_50 = arith.constant 0 : i32
    %145 = vector.broadcast %c0_i32_50 : i32 to vector<1x256xi32>
    %146 = arith.addi %4, %145 : vector<1x256xi32>
    %c16_i32_51 = arith.constant 16 : i32
    %147 = vector.broadcast %c16_i32_51 : i32 to vector<1x256xi32>
    %148 = arith.cmpi slt, %146, %147 : vector<1x256xi32>
    %149 = arith.andi %144, %148 : vector<1x256xi1>
    %150 = arith.extui %149 : vector<1x256xi1> to vector<1x256xi32>
    %151 = arith.sitofp %150 : vector<1x256xi32> to vector<1x256xf32>
    %c1_i32_52 = arith.constant 1 : i32
    %152 = vector.broadcast %c1_i32_52 : i32 to vector<1x256xi32>
    %153 = arith.addi %2, %152 : vector<1x256xi32>
    %c0_i32_53 = arith.constant 0 : i32
    %154 = vector.broadcast %c0_i32_53 : i32 to vector<1x256xi32>
    %155 = arith.cmpi sge, %153, %154 : vector<1x256xi32>
    %c1_i32_54 = arith.constant 1 : i32
    %156 = vector.broadcast %c1_i32_54 : i32 to vector<1x256xi32>
    %157 = arith.addi %2, %156 : vector<1x256xi32>
    %c16_i32_55 = arith.constant 16 : i32
    %158 = vector.broadcast %c16_i32_55 : i32 to vector<1x256xi32>
    %159 = arith.cmpi slt, %157, %158 : vector<1x256xi32>
    %160 = arith.andi %155, %159 : vector<1x256xi1>
    %c1_i32_56 = arith.constant 1 : i32
    %161 = vector.broadcast %c1_i32_56 : i32 to vector<1x256xi32>
    %162 = arith.addi %4, %161 : vector<1x256xi32>
    %c0_i32_57 = arith.constant 0 : i32
    %163 = vector.broadcast %c0_i32_57 : i32 to vector<1x256xi32>
    %164 = arith.cmpi sge, %162, %163 : vector<1x256xi32>
    %165 = arith.andi %160, %164 : vector<1x256xi1>
    %c1_i32_58 = arith.constant 1 : i32
    %166 = vector.broadcast %c1_i32_58 : i32 to vector<1x256xi32>
    %167 = arith.addi %4, %166 : vector<1x256xi32>
    %c16_i32_59 = arith.constant 16 : i32
    %168 = vector.broadcast %c16_i32_59 : i32 to vector<1x256xi32>
    %169 = arith.cmpi slt, %167, %168 : vector<1x256xi32>
    %170 = arith.andi %165, %169 : vector<1x256xi1>
    %171 = arith.extui %170 : vector<1x256xi1> to vector<1x256xi32>
    %172 = arith.sitofp %171 : vector<1x256xi32> to vector<1x256xf32>
    %c0 = arith.constant 0 : index
    %c0_60 = arith.constant 0 : index
    %c0_61 = arith.constant 0 : index
    %173 = vector.load %arg1[%c0, %c0_60, %c0_61] : memref<1x8x256xf32, #tpu.memory_space<vmem>>, vector<1x8x256xf32>
    %174 = vector.shape_cast %173 : vector<1x8x256xf32> to vector<8x256xf32>
    %c17_i32 = arith.constant 17 : i32
    %175 = tpu.dynamic_rotate %174 by %c17_i32 dim 1 : vector<8x256xf32>, i32 -> vector<8x256xf32>
    %176 = vector.broadcast %25 : vector<1x256xf32> to vector<8x256xf32>
    %177 = arith.mulf %175, %176 : vector<8x256xf32>
    %c0_62 = arith.constant 0 : index
    %c0_63 = arith.constant 0 : index
    %178 = vector.load %arg7[%c0_62, %c0_63] : memref<72x256xf32, #tpu.memory_space<vmem>>, vector<8x256xf32>
    tpu.vector_store %arg7[%c0_62, %c0_63], %177 {strides = array<i32>} : memref<72x256xf32, #tpu.memory_space<vmem>>, vector<8x256xf32>,
    %c16_i32_64 = arith.constant 16 : i32
    %179 = tpu.dynamic_rotate %174 by %c16_i32_64 dim 1 : vector<8x256xf32>, i32 -> vector<8x256xf32>
    %180 = vector.broadcast %46 : vector<1x256xf32> to vector<8x256xf32>
    %181 = arith.mulf %179, %180 : vector<8x256xf32>
    %c8 = arith.constant 8 : index
    %c0_65 = arith.constant 0 : index
    %182 = vector.load %arg7[%c8, %c0_65] : memref<72x256xf32, #tpu.memory_space<vmem>>, vector<8x256xf32>
    tpu.vector_store %arg7[%c8, %c0_65], %181 {strides = array<i32>} : memref<72x256xf32, #tpu.memory_space<vmem>>, vector<8x256xf32>,
    %c15_i32_66 = arith.constant 15 : i32
    %183 = tpu.dynamic_rotate %174 by %c15_i32_66 dim 1 : vector<8x256xf32>, i32 -> vector<8x256xf32>
    %184 = vector.broadcast %67 : vector<1x256xf32> to vector<8x256xf32>
    %185 = arith.mulf %183, %184 : vector<8x256xf32>
    %c16 = arith.constant 16 : index
    %c0_67 = arith.constant 0 : index
    %186 = vector.load %arg7[%c16, %c0_67] : memref<72x256xf32, #tpu.memory_space<vmem>>, vector<8x256xf32>
    tpu.vector_store %arg7[%c16, %c0_67], %185 {strides = array<i32>} : memref<72x256xf32, #tpu.memory_space<vmem>>, vector<8x256xf32>,
    %c1_i32_68 = arith.constant 1 : i32
    %187 = tpu.dynamic_rotate %174 by %c1_i32_68 dim 1 : vector<8x256xf32>, i32 -> vector<8x256xf32>
    %188 = vector.broadcast %88 : vector<1x256xf32> to vector<8x256xf32>
    %189 = arith.mulf %187, %188 : vector<8x256xf32>
    %c24 = arith.constant 24 : index
    %c0_69 = arith.constant 0 : index
    %190 = vector.load %arg7[%c24, %c0_69] : memref<72x256xf32, #tpu.memory_space<vmem>>, vector<8x256xf32>
    tpu.vector_store %arg7[%c24, %c0_69], %189 {strides = array<i32>} : memref<72x256xf32, #tpu.memory_space<vmem>>, vector<8x256xf32>,
    %c32 = arith.constant 32 : index
    %c0_70 = arith.constant 0 : index
    %191 = vector.load %arg7[%c32, %c0_70] : memref<72x256xf32, #tpu.memory_space<vmem>>, vector<8x256xf32>
    tpu.vector_store %arg7[%c32, %c0_70], %174 {strides = array<i32>} : memref<72x256xf32, #tpu.memory_space<vmem>>, vector<8x256xf32>,
    %c255_i32 = arith.constant 255 : i32
    %192 = tpu.dynamic_rotate %174 by %c255_i32 dim 1 : vector<8x256xf32>, i32 -> vector<8x256xf32>
    %193 = vector.broadcast %109 : vector<1x256xf32> to vector<8x256xf32>
    %194 = arith.mulf %192, %193 : vector<8x256xf32>
    %c40 = arith.constant 40 : index
    %c0_71 = arith.constant 0 : index
    %195 = vector.load %arg7[%c40, %c0_71] : memref<72x256xf32, #tpu.memory_space<vmem>>, vector<8x256xf32>
    tpu.vector_store %arg7[%c40, %c0_71], %194 {strides = array<i32>} : memref<72x256xf32, #tpu.memory_space<vmem>>, vector<8x256xf32>,
    %c241_i32 = arith.constant 241 : i32
    %196 = tpu.dynamic_rotate %174 by %c241_i32 dim 1 : vector<8x256xf32>, i32 -> vector<8x256xf32>
    %197 = vector.broadcast %130 : vector<1x256xf32> to vector<8x256xf32>
    %198 = arith.mulf %196, %197 : vector<8x256xf32>
    %c48 = arith.constant 48 : index
    %c0_72 = arith.constant 0 : index
    %199 = vector.load %arg7[%c48, %c0_72] : memref<72x256xf32, #tpu.memory_space<vmem>>, vector<8x256xf32>
    tpu.vector_store %arg7[%c48, %c0_72], %198 {strides = array<i32>} : memref<72x256xf32, #tpu.memory_space<vmem>>, vector<8x256xf32>,
    %c240_i32 = arith.constant 240 : i32
    %200 = tpu.dynamic_rotate %174 by %c240_i32 dim 1 : vector<8x256xf32>, i32 -> vector<8x256xf32>
    %201 = vector.broadcast %151 : vector<1x256xf32> to vector<8x256xf32>
    %202 = arith.mulf %200, %201 : vector<8x256xf32>
    %c56 = arith.constant 56 : index
    %c0_73 = arith.constant 0 : index
    %203 = vector.load %arg7[%c56, %c0_73] : memref<72x256xf32, #tpu.memory_space<vmem>>, vector<8x256xf32>
    tpu.vector_store %arg7[%c56, %c0_73], %202 {strides = array<i32>} : memref<72x256xf32, #tpu.memory_space<vmem>>, vector<8x256xf32>,
    %c239_i32 = arith.constant 239 : i32
    %204 = tpu.dynamic_rotate %174 by %c239_i32 dim 1 : vector<8x256xf32>, i32 -> vector<8x256xf32>
    %205 = vector.broadcast %172 : vector<1x256xf32> to vector<8x256xf32>
    %206 = arith.mulf %204, %205 : vector<8x256xf32>
    %c64 = arith.constant 64 : index
    %c0_74 = arith.constant 0 : index
    %207 = vector.load %arg7[%c64, %c0_74] : memref<72x256xf32, #tpu.memory_space<vmem>>, vector<8x256xf32>
    tpu.vector_store %arg7[%c64, %c0_74], %206 {strides = array<i32>} : memref<72x256xf32, #tpu.memory_space<vmem>>, vector<8x256xf32>,
    %c0_75 = arith.constant 0 : index
    %c0_76 = arith.constant 0 : index
    %208 = vector.load %arg2[%c0_75, %c0_76] : memref<8x72xf32, #tpu.memory_space<vmem>>, vector<8x72xf32>
    %c0_77 = arith.constant 0 : index
    %c0_78 = arith.constant 0 : index
    %209 = vector.load %arg7[%c0_77, %c0_78] : memref<72x256xf32, #tpu.memory_space<vmem>>, vector<72x256xf32>
    %cst = arith.constant dense<0.000000e+00> : vector<8x256xf32>
    %210 = tpu.matmul %208, %209, %cst {dimension_numbers = #tpu.dot_dimension_numbers<[1], [0], [0], [1], [0, 0, 1, 1], [], []>} : vector<8x72xf32>, vector<72x256xf32>, vector<8x256xf32> -> vector<8x256xf32>
    %c0_79 = arith.constant 0 : index
    %c0_80 = arith.constant 0 : index
    %211 = vector.load %arg3[%c0_79, %c0_80] : memref<8x1xf32, #tpu.memory_space<vmem>>, vector<8x1xf32>
    %212 = vector.broadcast %211 : vector<8x1xf32> to vector<8x256xf32>
    %213 = arith.addf %210, %212 : vector<8x256xf32>
    %cst_81 = arith.constant 0.000000e+00 : f32
    %214 = vector.broadcast %cst_81 : f32 to vector<8x256xf32>
    %215 = arith.maximumf %213, %214 : vector<8x256xf32>
    %c17_i32_82 = arith.constant 17 : i32
    %216 = tpu.dynamic_rotate %215 by %c17_i32_82 dim 1 : vector<8x256xf32>, i32 -> vector<8x256xf32>
    %217 = vector.broadcast %25 : vector<1x256xf32> to vector<8x256xf32>
    %218 = arith.mulf %216, %217 : vector<8x256xf32>
    %c0_83 = arith.constant 0 : index
    %c0_84 = arith.constant 0 : index
    %219 = vector.load %arg8[%c0_83, %c0_84] : memref<72x256xf32, #tpu.memory_space<vmem>>, vector<8x256xf32>
    tpu.vector_store %arg8[%c0_83, %c0_84], %218 {strides = array<i32>} : memref<72x256xf32, #tpu.memory_space<vmem>>, vector<8x256xf32>,
    %c16_i32_85 = arith.constant 16 : i32
    %220 = tpu.dynamic_rotate %215 by %c16_i32_85 dim 1 : vector<8x256xf32>, i32 -> vector<8x256xf32>
    %221 = vector.broadcast %46 : vector<1x256xf32> to vector<8x256xf32>
    %222 = arith.mulf %220, %221 : vector<8x256xf32>
    %c8_86 = arith.constant 8 : index
    %c0_87 = arith.constant 0 : index
    %223 = vector.load %arg8[%c8_86, %c0_87] : memref<72x256xf32, #tpu.memory_space<vmem>>, vector<8x256xf32>
    tpu.vector_store %arg8[%c8_86, %c0_87], %222 {strides = array<i32>} : memref<72x256xf32, #tpu.memory_space<vmem>>, vector<8x256xf32>,
    %c15_i32_88 = arith.constant 15 : i32
    %224 = tpu.dynamic_rotate %215 by %c15_i32_88 dim 1 : vector<8x256xf32>, i32 -> vector<8x256xf32>
    %225 = vector.broadcast %67 : vector<1x256xf32> to vector<8x256xf32>
    %226 = arith.mulf %224, %225 : vector<8x256xf32>
    %c16_89 = arith.constant 16 : index
    %c0_90 = arith.constant 0 : index
    %227 = vector.load %arg8[%c16_89, %c0_90] : memref<72x256xf32, #tpu.memory_space<vmem>>, vector<8x256xf32>
    tpu.vector_store %arg8[%c16_89, %c0_90], %226 {strides = array<i32>} : memref<72x256xf32, #tpu.memory_space<vmem>>, vector<8x256xf32>,
    %c1_i32_91 = arith.constant 1 : i32
    %228 = tpu.dynamic_rotate %215 by %c1_i32_91 dim 1 : vector<8x256xf32>, i32 -> vector<8x256xf32>
    %229 = vector.broadcast %88 : vector<1x256xf32> to vector<8x256xf32>
    %230 = arith.mulf %228, %229 : vector<8x256xf32>
    %c24_92 = arith.constant 24 : index
    %c0_93 = arith.constant 0 : index
    %231 = vector.load %arg8[%c24_92, %c0_93] : memref<72x256xf32, #tpu.memory_space<vmem>>, vector<8x256xf32>
    tpu.vector_store %arg8[%c24_92, %c0_93], %230 {strides = array<i32>} : memref<72x256xf32, #tpu.memory_space<vmem>>, vector<8x256xf32>,
    %c32_94 = arith.constant 32 : index
    %c0_95 = arith.constant 0 : index
    %232 = vector.load %arg8[%c32_94, %c0_95] : memref<72x256xf32, #tpu.memory_space<vmem>>, vector<8x256xf32>
    tpu.vector_store %arg8[%c32_94, %c0_95], %215 {strides = array<i32>} : memref<72x256xf32, #tpu.memory_space<vmem>>, vector<8x256xf32>,
    %c255_i32_96 = arith.constant 255 : i32
    %233 = tpu.dynamic_rotate %215 by %c255_i32_96 dim 1 : vector<8x256xf32>, i32 -> vector<8x256xf32>
    %234 = vector.broadcast %109 : vector<1x256xf32> to vector<8x256xf32>
    %235 = arith.mulf %233, %234 : vector<8x256xf32>
    %c40_97 = arith.constant 40 : index
    %c0_98 = arith.constant 0 : index
    %236 = vector.load %arg8[%c40_97, %c0_98] : memref<72x256xf32, #tpu.memory_space<vmem>>, vector<8x256xf32>
    tpu.vector_store %arg8[%c40_97, %c0_98], %235 {strides = array<i32>} : memref<72x256xf32, #tpu.memory_space<vmem>>, vector<8x256xf32>,
    %c241_i32_99 = arith.constant 241 : i32
    %237 = tpu.dynamic_rotate %215 by %c241_i32_99 dim 1 : vector<8x256xf32>, i32 -> vector<8x256xf32>
    %238 = vector.broadcast %130 : vector<1x256xf32> to vector<8x256xf32>
    %239 = arith.mulf %237, %238 : vector<8x256xf32>
    %c48_100 = arith.constant 48 : index
    %c0_101 = arith.constant 0 : index
    %240 = vector.load %arg8[%c48_100, %c0_101] : memref<72x256xf32, #tpu.memory_space<vmem>>, vector<8x256xf32>
    tpu.vector_store %arg8[%c48_100, %c0_101], %239 {strides = array<i32>} : memref<72x256xf32, #tpu.memory_space<vmem>>, vector<8x256xf32>,
    %c240_i32_102 = arith.constant 240 : i32
    %241 = tpu.dynamic_rotate %215 by %c240_i32_102 dim 1 : vector<8x256xf32>, i32 -> vector<8x256xf32>
    %242 = vector.broadcast %151 : vector<1x256xf32> to vector<8x256xf32>
    %243 = arith.mulf %241, %242 : vector<8x256xf32>
    %c56_103 = arith.constant 56 : index
    %c0_104 = arith.constant 0 : index
    %244 = vector.load %arg8[%c56_103, %c0_104] : memref<72x256xf32, #tpu.memory_space<vmem>>, vector<8x256xf32>
    tpu.vector_store %arg8[%c56_103, %c0_104], %243 {strides = array<i32>} : memref<72x256xf32, #tpu.memory_space<vmem>>, vector<8x256xf32>,
    %c239_i32_105 = arith.constant 239 : i32
    %245 = tpu.dynamic_rotate %215 by %c239_i32_105 dim 1 : vector<8x256xf32>, i32 -> vector<8x256xf32>
    %246 = vector.broadcast %172 : vector<1x256xf32> to vector<8x256xf32>
    %247 = arith.mulf %245, %246 : vector<8x256xf32>
    %c64_106 = arith.constant 64 : index
    %c0_107 = arith.constant 0 : index
    %248 = vector.load %arg8[%c64_106, %c0_107] : memref<72x256xf32, #tpu.memory_space<vmem>>, vector<8x256xf32>
    tpu.vector_store %arg8[%c64_106, %c0_107], %247 {strides = array<i32>} : memref<72x256xf32, #tpu.memory_space<vmem>>, vector<8x256xf32>,
    %c0_108 = arith.constant 0 : index
    %c0_109 = arith.constant 0 : index
    %249 = vector.load %arg4[%c0_108, %c0_109] : memref<8x72xf32, #tpu.memory_space<vmem>>, vector<8x72xf32>
    %c0_110 = arith.constant 0 : index
    %c0_111 = arith.constant 0 : index
    %250 = vector.load %arg8[%c0_110, %c0_111] : memref<72x256xf32, #tpu.memory_space<vmem>>, vector<72x256xf32>
    %cst_112 = arith.constant dense<0.000000e+00> : vector<8x256xf32>
    %251 = tpu.matmul %249, %250, %cst_112 {dimension_numbers = #tpu.dot_dimension_numbers<[1], [0], [0], [1], [0, 0, 1, 1], [], []>} : vector<8x72xf32>, vector<72x256xf32>, vector<8x256xf32> -> vector<8x256xf32>
    %c0_113 = arith.constant 0 : index
    %c0_114 = arith.constant 0 : index
    %252 = vector.load %arg5[%c0_113, %c0_114] : memref<8x1xf32, #tpu.memory_space<vmem>>, vector<8x1xf32>
    %253 = vector.broadcast %252 : vector<8x1xf32> to vector<8x256xf32>
    %254 = arith.addf %251, %253 : vector<8x256xf32>
    %c0_115 = arith.constant 0 : index
    %c0_116 = arith.constant 0 : index
    %c0_117 = arith.constant 0 : index
    %255 = vector.load %arg6[%c0_115, %c0_116, %c0_117] : memref<1x8x256xf32, #tpu.memory_space<vmem>>, vector<1x8x256xf32>
    %256 = vector.shape_cast %255 : vector<1x8x256xf32> to vector<8x256xf32>
    %257 = vector.shape_cast %254 : vector<8x256xf32> to vector<1x8x256xf32>
    tpu.vector_store %arg6[%c0_115, %c0_116, %c0_117], %257 {strides = array<i32>} : memref<1x8x256xf32, #tpu.memory_space<vmem>>, vector<1x8x256xf32>,
    return
  }
  func.func @transform_0(%arg0: i32) -> (i32, i32, i32) {
    %c0_i32 = arith.constant 0 : i32
    %c0_i32_0 = arith.constant 0 : i32
    %c0_i32_1 = arith.constant 0 : i32
    return %arg0, %c0_i32, %c0_i32_0 : i32, i32, i32
  }
  func.func @transform_1(%arg0: i32) -> (i32, i32) {
    %c0_i32 = arith.constant 0 : i32
    %c0_i32_0 = arith.constant 0 : i32
    %c0_i32_1 = arith.constant 0 : i32
    return %c0_i32, %c0_i32_0 : i32, i32
  }
  func.func @transform_2(%arg0: i32) -> (i32, i32) {
    %c0_i32 = arith.constant 0 : i32
    %c0_i32_0 = arith.constant 0 : i32
    %c0_i32_1 = arith.constant 0 : i32
    return %c0_i32, %c0_i32_0 : i32, i32
  }
  func.func @transform_3(%arg0: i32) -> (i32, i32) {
    %c0_i32 = arith.constant 0 : i32
    %c0_i32_0 = arith.constant 0 : i32
    %c0_i32_1 = arith.constant 0 : i32
    return %c0_i32, %c0_i32_0 : i32, i32
  }
  func.func @transform_4(%arg0: i32) -> (i32, i32) {
    %c0_i32 = arith.constant 0 : i32
    %c0_i32_0 = arith.constant 0 : i32
    %c0_i32_1 = arith.constant 0 : i32
    return %c0_i32, %c0_i32_0 : i32, i32
  }
  func.func @transform_5(%arg0: i32) -> (i32, i32, i32) {
    %c0_i32 = arith.constant 0 : i32
    %c0_i32_0 = arith.constant 0 : i32
    %c0_i32_1 = arith.constant 0 : i32
    return %arg0, %c0_i32, %c0_i32_0 : i32, i32, i32
  }
}

</mosaic_0001>

<bundles_post_ra>
// kernel: residual_forward.1
= control target key start
LH: loop header
LB: loop body
LE: loop exit
PB: predicated region body
PF: predicated region fallthrough
CT: control target
= control target key end

     0   :  { %s805_s18 = smov 0   ;;  %s1180_s0 = inlined_call_operand.vmem [shape: f32[2,8,256], index: 0, kind: input, shape index: {}]   ;;  %s1181_s1 = inlined_call_operand.vmem [shape: f32[8,72], index: 1, kind: input, shape index: {}]   ;;  %s1182_s2 = inlined_call_operand.vmem [shape: f32[8,1], index: 2, kind: input, shape index: {}]   ;;  %s1183_s3 = inlined_call_operand.vmem [shape: f32[8,72], index: 3, kind: input, shape index: {}]   ;;  %s1184_s4 = inlined_call_operand.vmem [shape: f32[8,1], index: 4, kind: input, shape index: {}]   ;;  %s1185_s5 = inlined_call_operand.vmem [shape: f32[2,8,256], index: 5, kind: output, shape index: {}]  }
   0x1 LB: > { %s704_s19 = sadd.s32 4294967295, %s763_s18   ;;  %p708_p0 = scmp.ge.s32.totalorder %s763_s18, 1  ;;  %s763_s18 = sphi %s805_s18, %s15_s18  }
   0x2   : > { %p187_p1 = scmp.lt.s32.totalorder %s763_s18, 3 }
   0x4   : > { %p188_p2 = pnand %p708_p0, %p187_p1 }
   0x5   : > { %p215_p3 = scmp.lt.s32.totalorder (!%p188_p2), %s704_s19, 1  ;;  %s765_s24 = smov (!%p188_p2), 112  }
   0x6   : > { %191 = sbr.rel (%p188_p2) target bundleno = 594 (0x252), region = 40  ;;  %s766_s25 = smov (!%p188_p2), 111  }
   0x7   : > { %s767_s26 = smov (!%p188_p2), 113   ;;  %s768_s27 = smov (!%p188_p2), 127  }
   0x8   : > { %s769_s28 = smov (!%p188_p2), 1   ;;  %s770_s29 = smov (!%p188_p2), 15  }
   0x9   : > { %s771_s30 = smov (!%p188_p2), 16   ;;  %s772_s6 = smov (!%p188_p2), 17  }
   0xb   : > { %s1213_s19 = smov (!%p215_p3, %s704_s19), 1  ;;  %v225_v2 = vlaneseq  ;;  %v773_v22 = vmov 0.0   ;;  %v445_v50 = vld [vmem:[%s1182_s2] sm:$0xff]  ;;  %v774_v54 = vmov 0  }
   0xc   : > { %s735_s20 = sshll.u32 %s1213_s19, 4  ;;  %755 = vset.pattern.permute.xlu1 %v774_v54  ;;  %756 = vset.pattern.permute.xlu0 %v774_v54  ;;  %v426_v36 = vld [vmem:[%s1181_s1] sm:$0xff] }
   0xd   : > { %s219_s23 = scalar_lea.vmem %s1180_s0, %s735_s20  ;;  %v857_v3 = vand.u32 127, %v225_v2  ;;  %s224_s17 = scalar_lea.vmem %s1185_s5, %s735_s20 }
   0xe   : > { %v821_v0 = vld [vmem:[%s219_s23] sm:$0xff]  ;;  %v829_v1 = vld [vmem:[%s219_s23 + $0x8] sm:$0xff] }
   0xf   : > { %404 = vrot.lane.b32.xlu1 %v821_v0, %s765_s24  ;;  %415 = vrot.lane.b32.xlu0 %v821_v0, %s766_s25  ;;  %v227_v4 = vadd.s32 128, %v857_v3  ;;  %v228_v5 = vshra.s32 %v857_v3, 4  ;;  %v230_v7 = vand.u32 15, %v857_v3  ;;  %vm408_vm14 = vcmp.lt.s32.totalorder %v857_v3, 112 }
  0x10   : > { %393 = vrot.lane.b32.xlu2 %v821_v0, %s767_s26  ;;  %vm419_vm15 = vcmp.lt.s32.totalorder %v857_v3, 111 }
  0x11   : > { %v229_v6 = vshra.s32 %v227_v4, 4  ;;  %v302_v8 = vadd.s32 1, %v228_v5  ;;  %v231_v9 = vand.u32 15, %v227_v4  ;;  %v862_v12 = vadd.s32 1, %v230_v7 }
  0x12   : > { %v866_v14 = vadd.s32 4294967295, %v230_v7  ;;  %vm280_vm12 = vcmp.ge.s32.totalorder %v228_v5, 0  ;;  %vm282_vm13 = vcmp.lt.s32.totalorder %v228_v5, 16  ;;  %v232_v31 = vadd.s32 4294967295, %v228_v5 }
  0x13   : > { %v303_v11 = vadd.s32 1, %v229_v6  ;;  %vm304_vm0 = vcmp.ge.s32.totalorder %v302_v8, 0  ;;  %vm306_vm1 = vcmp.lt.s32.totalorder %v302_v8, 16  ;;  %v864_v13 = vadd.s32 1, %v231_v9 }
  0x14   : > { %vm272_vm4 = vcmp.lt.s32.totalorder %v862_v12, 16  ;;  %vm869_vm5 = vmand %vm304_vm0, %vm306_vm1  ;;  %v873_v18 = vadd.s32 4294967295, %v231_v9  ;;  %vm1186_vm9 = vcmp.ge.s32.totalorder %v866_v14, 0  ;;  %vm281_vm1 = vcmp.ge.s32.totalorder %v229_v6, 0 }
  0x15   : > { %vm305_vm2 = vcmp.ge.s32.totalorder %v303_v11, 0  ;;  %vm307_vm3 = vcmp.lt.s32.totalorder %v303_v11, 16  ;;  %vm273_vm6 = vcmp.lt.s32.totalorder %v864_v13, 16  ;;  %vm328_vm8 = vmand %vm869_vm5, %vm272_vm4  ;;  %v918_v28 = vsel %vm869_vm5, 1.0, %v773_v22 }
  0x16   : > { %vm876_vm7 = vmand %vm305_vm2, %vm307_vm3  ;;  %vm243_vm11 = vcmp.ge.s32.totalorder %v873_v18, 0  ;;  %vm283_vm2 = vcmp.lt.s32.totalorder %v229_v6, 16  ;;  %v901_v23 = vsel %vm328_vm8, 1.0, %v773_v22  ;;  %v233_v39 = vadd.s32 4294967295, %v229_v6 }
  0x17   : > { %406 = vrot.lane.b32.xlu1 %v829_v1, %s765_s24  ;;  %417 = vrot.lane.b32.xlu0 %v829_v1, %s766_s25  ;;  %vm329_vm10 = vmand %vm876_vm7, %vm273_vm6  ;;  %v923_v29 = vsel %vm876_vm7, 1.0, %v773_v22 }
  0x18   : > { %395 = vrot.lane.b32.xlu2 %v829_v1, %s767_s26  ;;  %vm896_vm0 = vmand %vm869_vm5, %vm1186_vm9  ;;  %v904_v24 = vsel %vm329_vm10, 1.0, %v773_v22  ;;  %vm1187_vm9 = vcmp.lt.s32.totalorder %v857_v3, 113 }
  0x19   : > { %vm910_vm3 = vmand %vm876_vm7, %vm243_vm11  ;;  %v954_v42 = vsel %vm896_vm0, 1.0, %v773_v22  ;;  %vm236_vm0 = vcmp.lt.s32.totalorder %v232_v31, 16 }
  0x1a   : > { %vm927_vm8 = vmand %vm280_vm12, %vm282_vm13  ;;  %v959_v43 = vsel %vm910_vm3, 1.0, %v773_v22  ;;  %vm386_vm12 = vcmp.lt.s32.totalorder %v857_v3, 127  ;;  %vm234_vm13 = vcmp.ge.s32.totalorder %v232_v31, 0  ;;  %vm1202_vm3 = vcmp.ge.s32.totalorder %v866_v14, 0 }
  0x1b   : > { %vm941_vm5 = vmand %vm281_vm1, %vm283_vm2  ;;  %vm235_vm1 = vcmp.ge.s32.totalorder %v233_v39, 0  ;;  %vm237_vm2 = vcmp.lt.s32.totalorder %v233_v39, 16 }
  0x1c   : > { %vm965_vm7 = vmand %vm927_vm8, %vm272_vm4 }
  0x1d   : > { %vm297_vm10 = vmand %vm941_vm5, %vm273_vm6  ;;  %v984_v51 = vsel %vm965_vm7, 1.0, %v773_v22 }
  0x1e   : > { %v987_v52 = vsel %vm297_vm10, 1.0, %v773_v22  ;;  %vm999_vm7 = vmand %vm234_vm13, %vm236_vm0 }
  0x1f   : > { %384 = vrot.lane.b32.xlu1 %v829_v1, %s768_s27  ;;  %382 = vrot.lane.b32.xlu0 %v821_v0, %s768_s27  ;;  %vm287_vm10 = vmand %vm941_vm5, %vm243_vm11  ;;  %vm362_vm5 = vcmp.lt.s32.totalorder %v857_v3, 15 }
  0x20   : > { %369 = vrot.lane.b32.xlu2 %v821_v0, %s769_s28  ;;  %vm274_vm13 = vmand %vm999_vm7, %vm272_vm4  ;;  %v1037_v4 = vsel %vm287_vm10, 1.0, %v773_v22  ;;  %vm351_vm4 = vcmp.lt.s32.totalorder %v857_v3, 16 }
  0x21   : > { %v1040_v5 = vsel %vm274_vm13, 1.0, %v773_v22 }
  0x27   : > { %358 = vrot.lane.b32.xlu1 %v821_v0, %s770_s29  ;;  %371 = vrot.lane.b32.xlu0 %v829_v1, %s769_s28 }
  0x28   : > { %360 = vrot.lane.b32.xlu2 %v829_v1, %s770_s29 }
  0x2f   : > { %349 = vrot.lane.b32.xlu1 %v829_v1, %s771_s30  ;;  %347 = vrot.lane.b32.xlu0 %v821_v0, %s771_s30 }
  0x30   : > { %336 = vrot.lane.b32.xlu2 %v821_v0, %s772_s6 }
  0x37   : > { %338 = vrot.lane.b32.xlu0 %v829_v1, %s772_s6  ;;  %448 = vperm.xlu1 %755, %v445_v50  }
  0x6a   : > { %v394_v10 = vpop.permute.xlu2 %393 }
  0x72   : > { %v396_v20 = vpop.permute.xlu2 %395 }
  0x73   : > { %v398_v40 = vsel %vm1187_vm9, %v394_v10, %v396_v20  ;;  %v399_v41 = vsel %vm1187_vm9, %v396_v20, %v394_v10  ;;  %vm993_vm9 = vmand %vm927_vm8, %vm1202_vm3 }
  0x74   : > { %v400_v48 = vmul.f32 %v954_v42, %v398_v40  ;;  %v401_v49 = vmul.f32 %v959_v43, %v399_v41  ;;  %vm1009_vm8 = vmand %vm235_vm1, %vm237_vm2  ;;  %vm373_vm1 = vcmp.lt.s32.totalorder %v857_v3, 1  ;;  %v1034_v2 = vsel %vm993_vm9, 1.0, %v773_v22 }
  0x75   : > { %vm275_vm0 = vmand %vm1009_vm8, %vm273_vm6  ;;  %v1066_v17 = vsel %vm1009_vm8, 1.0, %v773_v22 }
  0x76   : > { %v1043_v6 = vsel %vm275_vm0, 1.0, %v773_v22  ;;  %vm1209_vm6 = vmmov %vm1202_vm3  ;;  %vm340_vm3 = vcmp.lt.s32.totalorder %v857_v3, 17 }
  0x77   : > { %vm244_vm9 = vmand %vm999_vm7, %vm1209_vm6 }
  0x78   : > { %vm245_vm2 = vmand %vm1009_vm8, %vm243_vm11  ;;  %v1084_v31 = vsel %vm244_vm9, 1.0, %v773_v22  ;;  %vm451_vm11 = vcmask 588800  }
  0x7a   : > { %v370_v47 = vpop.permute.xlu2 %369 }
  0x81   : > { %v405_v15 = vpop.permute.xlu1 %404  ;;  %v416_v16 = vpop.permute.xlu0 %415 }
  0x82   : > { %v361_v63 = vpop.permute.xlu2 %360 }
  0x89   : > { %v407_v26 = vpop.permute.xlu1 %406  ;;  %v418_v27 = vpop.permute.xlu0 %417 }
  0x8a   : > { %v409_v32 = vsel %vm408_vm14, %v405_v15, %v407_v26  ;;  %v410_v33 = vsel %vm408_vm14, %v407_v26, %v405_v15  ;;  %v420_v34 = vsel %vm419_vm15, %v416_v16, %v418_v27  ;;  %v421_v35 = vsel %vm419_vm15, %v418_v27, %v416_v16  ;;  %v337_v30 = vpop.permute.xlu2 %336 }
  0x8b   : > { %v422_v37 = vmul.f32 %v901_v23, %v420_v34  ;;  %v423_v38 = vmul.f32 %v904_v24, %v421_v35  ;;  %v411_v45 = vmul.f32 %v918_v28, %v409_v32  ;;  %v412_v46 = vmul.f32 %v923_v29, %v410_v33 }
  0x8c   : > { %v1061_v16 = vsel %vm999_vm7, 1.0, %v773_v22  ;;  %v1087_v32 = vsel %vm245_vm2, 1.0, %v773_v22 }
  0x8d   : > { %462 = vmatpush.msra.mxu0 %v422_v37  ;;  %482 = vmatpush.msra.mxu1 %v423_v38 }
  0x8f   : > { %463 = vmatpush.msra.mxu0 %v411_v45  ;;  %483 = vmatpush.msra.mxu1 %v412_v46 }
  0x91   : > { %v385_v55 = vpop.permute.xlu1 %384  ;;  %464 = vmatpush.msra.mxu0 %v400_v48  ;;  %484 = vmatpush.msra.mxu1 %v401_v49  ;;  %v383_v56 = vpop.permute.xlu0 %382 }
  0x92   : > { %v387_v58 = vsel %vm386_vm12, %v383_v56, %v385_v55  ;;  %v388_v59 = vsel %vm386_vm12, %v385_v55, %v383_v56 }
  0x93   : > { %v389_v61 = vmul.f32 %v984_v51, %v387_v58  ;;  %v390_v62 = vmul.f32 %v987_v52, %v388_v59 }
  0x95   : > { %465 = vmatpush.msra.mxu0 %v389_v61  ;;  %485 = vmatpush.msra.mxu1 %v390_v62  ;;  %v598_v61 = vld [vmem:[%s1184_s4] sm:$0xff] }
  0x97   : > { %466 = vmatpush.msra.mxu0 %v821_v0  ;;  %486 = vmatpush.msra.mxu1 %v829_v1 }
  0x99   : > { %v359_v0 = vpop.permute.xlu1 %358  ;;  %v372_v7 = vpop.permute.xlu0 %371 }
  0x9a   : > { %v374_v1 = vsel %vm373_vm1, %v370_v47, %v372_v7  ;;  %v375_v8 = vsel %vm373_vm1, %v372_v7, %v370_v47  ;;  %v363_v9 = vsel %vm362_vm5, %v359_v0, %v361_v63  ;;  %v364_v10 = vsel %vm362_vm5, %v361_v63, %v359_v0 }
  0x9b   : > { %v376_v11 = vmul.f32 %v1034_v2, %v375_v8  ;;  %v377_v12 = vmul.f32 %v1037_v4, %v374_v1  ;;  %v365_v13 = vmul.f32 %v1040_v5, %v364_v10  ;;  %v366_v15 = vmul.f32 %v1043_v6, %v363_v9 }
  0x9d   : > { %467 = vmatpush.msra.mxu0 %v376_v11  ;;  %487 = vmatpush.msra.mxu1 %v377_v12 }
  0x9f   : > { %468 = vmatpush.msra.mxu0 %v365_v13  ;;  %488 = vmatpush.msra.mxu1 %v366_v15 }
  0xa1   : > { %v350_v19 = vpop.permute.xlu1 %349  ;;  %v348_v20 = vpop.permute.xlu0 %347 }
  0xa2   : > { %v352_v21 = vsel %vm351_vm4, %v348_v20, %v350_v19  ;;  %v353_v25 = vsel %vm351_vm4, %v350_v19, %v348_v20 }
  0xa3   : > { %v354_v26 = vmul.f32 %v1061_v16, %v353_v25  ;;  %v355_v27 = vmul.f32 %v1066_v17, %v352_v21 }
  0xa5   : > { %469 = vmatpush.msra.mxu0 %v354_v26  ;;  %489 = vmatpush.msra.mxu1 %v355_v27 }
  0xa9   : > { %v339_v14 = vpop.permute.xlu0 %338  ;;  %v449_v22 = vpop.permute.xlu1 %448 }
  0xaa   : > { %v341_v33 = vsel %vm340_vm3, %v337_v30, %v339_v14  ;;  %v342_v34 = vsel %vm340_vm3, %v339_v14, %v337_v30 }
  0xab   : > { %v343_v18 = vmul.f32 %v1084_v31, %v342_v34  ;;  %v344_v35 = vmul.f32 %v1087_v32, %v341_v33 }
  0xad   : > { %470 = vmatpush.msra.mxu0 %v343_v18  ;;  %490 = vmatpush.msra.mxu1 %v344_v35  ;;  %v579_v18 = vld [vmem:[%s1183_s3] sm:$0xff] }
  0xae   : > { %729 = vmatmul.msk.f32.vlgmr.msra.gmra.mxu0 %vm451_vm11, %v426_v36  ;;  %730 = vmatmul.msk.f32.vlgmr.msra.gmra.mxu1 %vm451_vm11, %v426_v36 }
 0x12b   : > { %v472_v37 = vpop.f32.mrf.mxu0  ;;  %v492_v38 = vpop.f32.mrf.mxu1 }
 0x12c   : > { %v473_v39 = vadd.f32 %v472_v37, %v449_v22  ;;  %v493_v40 = vadd.f32 %v492_v38, %v449_v22 }
 0x12e   : > { %v495_v41 = vmax.f32 %v473_v39, 0.0  ;;  %v496_v44 = vmax.f32 %v493_v40, 0.0 }
 0x130   : > { %559 = vrot.lane.b32.xlu1 %v495_v41, %s765_s24  ;;  %569 = vrot.lane.b32.xlu2 %v495_v41, %s766_s25 }
 0x131   : > { %571 = vrot.lane.b32.xlu0 %v496_v44, %s766_s25 }
 0x138   : > { %551 = vrot.lane.b32.xlu1 %v496_v44, %s767_s26  ;;  %561 = vrot.lane.b32.xlu2 %v496_v44, %s765_s24 }
 0x139   : > { %549 = vrot.lane.b32.xlu0 %v495_v41, %s767_s26 }
 0x140   : > { %527 = vrot.lane.b32.xlu1 %v495_v41, %s769_s28  ;;  %539 = vrot.lane.b32.xlu2 %v495_v41, %s768_s27 }
 0x141   : > { %541 = vrot.lane.b32.xlu0 %v496_v44, %s768_s27 }
 0x148   : > { %519 = vrot.lane.b32.xlu1 %v496_v44, %s770_s29  ;;  %529 = vrot.lane.b32.xlu2 %v496_v44, %s769_s28 }
 0x149   : > { %517 = vrot.lane.b32.xlu0 %v495_v41, %s770_s29 }
 0x150   : > { %497 = vrot.lane.b32.xlu1 %v495_v41, %s772_s6  ;;  %507 = vrot.lane.b32.xlu2 %v495_v41, %s771_s30 }
 0x151   : > { %509 = vrot.lane.b32.xlu0 %v496_v44, %s771_s30 }
 0x158   : > { %499 = vrot.lane.b32.xlu2 %v496_v44, %s772_s6 }
 0x159   : > { %601 = vperm.xlu0 %756, %v598_v61  }
 0x18a   : > { %v570_v45 = vpop.permute.xlu2 %569 }
 0x192   : > { %v562_v46 = vpop.permute.xlu2 %561 }
 0x19a   : > { %v540_v55 = vpop.permute.xlu2 %539 }
 0x1a2   : > { %v560_v47 = vpop.permute.xlu1 %559 }
 0x1a3   : > { %v572_v48 = vpop.permute.xlu0 %571  ;;  %v563_v49 = vsel %vm408_vm14, %v560_v47, %v562_v46  ;;  %v564_v50 = vsel %vm408_vm14, %v562_v46, %v560_v47  ;;  %vm1210_vm14 = vcmp.lt.s32.totalorder %v857_v3, 113 }
 0x1a4   : > { %v573_v53 = vsel %vm419_vm15, %v570_v45, %v572_v48  ;;  %v574_v54 = vsel %vm419_vm15, %v572_v48, %v570_v45  ;;  %v565_v58 = vmul.f32 %v918_v28, %v563_v49  ;;  %v566_v59 = vmul.f32 %v923_v29, %v564_v50  ;;  %vm1211_vm15 = vmmov %vm1210_vm14  ;;  %v530_v29 = vpop.permute.xlu2 %529 }
 0x1a5   : > { %v575_v56 = vmul.f32 %v901_v23, %v573_v53  ;;  %v576_v57 = vmul.f32 %v904_v24, %v574_v54 }
 0x1a7   : > { %614 = vmatpush.msra.mxu2 %v575_v56  ;;  %634 = vmatpush.msra.mxu3 %v576_v57 }
 0x1a9   : > { %615 = vmatpush.msra.mxu2 %v565_v58  ;;  %635 = vmatpush.msra.mxu3 %v566_v59 }
 0x1aa   : > { %v552_v60 = vpop.permute.xlu1 %551 }
 0x1ab   : > { %v550_v62 = vpop.permute.xlu0 %549 }
 0x1ac   : > { %v553_v23 = vsel %vm1210_vm14, %v550_v62, %v552_v60  ;;  %v554_v24 = vsel %vm1211_vm15, %v552_v60, %v550_v62  ;;  %v508_v11 = vpop.permute.xlu2 %507 }
 0x1ad   : > { %v555_v63 = vmul.f32 %v954_v42, %v553_v23  ;;  %v556_v28 = vmul.f32 %v959_v43, %v554_v24 }
 0x1af   : > { %616 = vmatpush.msra.mxu2 %v555_v63  ;;  %636 = vmatpush.msra.mxu3 %v556_v28 }
 0x1b2   : > { %v528_v0 = vpop.permute.xlu1 %527 }
 0x1b3   : > { %v542_v7 = vpop.permute.xlu0 %541  ;;  %v531_v42 = vsel %vm373_vm1, %v528_v0, %v530_v29  ;;  %v532_v43 = vsel %vm373_vm1, %v530_v29, %v528_v0 }
 0x1b4   : > { %v543_v1 = vsel %vm386_vm12, %v540_v55, %v542_v7  ;;  %v544_v8 = vsel %vm386_vm12, %v542_v7, %v540_v55  ;;  %v533_v12 = vmul.f32 %v1034_v2, %v532_v43  ;;  %v534_v13 = vmul.f32 %v1037_v4, %v531_v42  ;;  %v500_v2 = vpop.permute.xlu2 %499 }
 0x1b5   : > { %v545_v9 = vmul.f32 %v984_v51, %v543_v1  ;;  %v546_v10 = vmul.f32 %v987_v52, %v544_v8 }
 0x1b7   : > { %617 = vmatpush.msra.mxu2 %v545_v9  ;;  %637 = vmatpush.msra.mxu3 %v546_v10 }
 0x1b9   : > { %618 = vmatpush.msra.mxu2 %v495_v41  ;;  %638 = vmatpush.msra.mxu3 %v496_v44 }
 0x1ba   : > { %v520_v15 = vpop.permute.xlu1 %519 }
 0x1bb   : > { %619 = vmatpush.msra.mxu2 %v533_v12  ;;  %639 = vmatpush.msra.mxu3 %v534_v13  ;;  %v518_v51 = vpop.permute.xlu0 %517 }
 0x1bc   : > { %v521_v52 = vsel %vm362_vm5, %v518_v51, %v520_v15  ;;  %v522_v19 = vsel %vm362_vm5, %v520_v15, %v518_v51 }
 0x1bd   : > { %v523_v20 = vmul.f32 %v1040_v5, %v522_v19  ;;  %v524_v21 = vmul.f32 %v1043_v6, %v521_v52 }
 0x1bf   : > { %620 = vmatpush.msra.mxu2 %v523_v20  ;;  %640 = vmatpush.msra.mxu3 %v524_v21 }
 0x1c2   : > { %v498_v25 = vpop.permute.xlu1 %497 }
 0x1c3   : > { %v510_v26 = vpop.permute.xlu0 %509  ;;  %v501_v4 = vsel %vm340_vm3, %v498_v25, %v500_v2  ;;  %v502_v27 = vsel %vm340_vm3, %v500_v2, %v498_v25 }
 0x1c4   : > { %v511_v30 = vsel %vm351_vm4, %v508_v11, %v510_v26  ;;  %v512_v5 = vsel %vm351_vm4, %v510_v26, %v508_v11  ;;  %v503_v33 = vmul.f32 %v1084_v31, %v502_v27  ;;  %v504_v34 = vmul.f32 %v1087_v32, %v501_v4 }
 0x1c5   : > { %v513_v6 = vmul.f32 %v1061_v16, %v512_v5  ;;  %v514_v14 = vmul.f32 %v1066_v17, %v511_v30 }
 0x1c7   : > { %621 = vmatpush.msra.mxu2 %v513_v6  ;;  %641 = vmatpush.msra.mxu3 %v514_v14 }
 0x1c9   : > { %622 = vmatpush.msra.mxu2 %v503_v33  ;;  %642 = vmatpush.msra.mxu3 %v504_v34 }
 0x1ca   : > { %731 = vmatmul.msk.f32.vlgmr.msra.gmra.mxu2 %vm451_vm11, %v579_v18  ;;  %732 = vmatmul.msk.f32.vlgmr.msra.gmra.mxu3 %vm451_vm11, %v579_v18 }
 0x1cb   : > { %v602_v3 = vpop.permute.xlu0 %601 }
 0x24d   : > { %v624_v16 = vpop.f32.mrf.mxu2  ;;  %v644_v35 = vpop.f32.mrf.mxu3 }
 0x24e   : > { %v625_v17 = vadd.f32 %v624_v16, %v602_v3  ;;  %v645_v31 = vadd.f32 %v644_v35, %v602_v3 }
 0x250   : > { %647 = vst [vmem:[%s224_s17] sm:$0xff] %v625_v17 }
 0x251   : > { %648 = vst [vmem:[%s224_s17 + $0x8] sm:$0xff] %v645_v31 }
 0x252 PF: > { %s15_s18 = sadd.s32 1, %s763_s18  }
 0x253   : > { %p12_p4 = scmp.ge.s32.totalorder %s15_s18, 4  }
 0x255   :  { %14 = sbr.rel (!%p12_p4) target bundleno = 1 (0x1), region = 70 }

</bundles_post_ra>
